<compile_context>
chip_gen: v6e
topology: v6e:2x2x1
jax: 0.10.0
libtpu: 0.0.40
codegen_flags: <defaults>
</compile_context>

<pallas_src>
import jax
import jax.numpy as jnp
from jax.experimental import pallas as pl
from jax.experimental.pallas import tpu as pltpu

_LANE = 128
_MIB = 1024 * 1024


# ----------------------------------------------------------------------------
# Kernel body: one lane-dense MXU matmul per grid step.
# ----------------------------------------------------------------------------
def _nconv_kernel(at_ref, x_ref, o_ref):
    # at_ref: (Wout, V), x_ref: (V, T), o_ref: (Wout, T)   (batch dim squeezed)
    o_ref[...] = jnp.dot(
        at_ref[...], x_ref[...], preferred_element_type=jnp.float32
    ).astype(o_ref.dtype)


# ----------------------------------------------------------------------------
# VMEM budgeting (generation-aware) and tile selection.
# ----------------------------------------------------------------------------
def _vmem_limits():
    """Returns (per-step block budget, vmem_limit_bytes), generation-aware."""
    try:
        phys = int(pltpu.get_tpu_info().vmem_capacity_bytes)
    except Exception:
        phys = 64 * _MIB  # conservative fallback == v7x per-TC physical VMEM
    # Never request more than ~3/4 of physical: v7x -> 48 MiB, v5e/v6e -> 96 MiB.
    limit = min((3 * phys) // 4, 100 * _MIB)
    # Per-grid-step working set (double-buffered tiles + resident A) target.
    budget = min(limit // 2, 24 * _MIB)
    return budget, limit


def _choose_tile(M, V, Wout, itemsize, *, a_per_batch, min_steps, budget):
    """Largest lane tile (multiple of 128, or all of M) fitting `budget`,
    then capped so this grid axis has >= min_steps steps (v7x occupancy)."""
    # Shared A is resident (constant index_map): count once. Per-batch A is
    # streamed: double-buffered.   (feedback #8: no double-counting.)
    a_bytes = (2 if a_per_batch else 1) * Wout * V * itemsize
    avail = max(budget - a_bytes, 0)          # guard: huge (meta-folded) A
    per_lane = 2 * (V + Wout) * itemsize      # x tile + out tile, double-buffered
    tm = avail // per_lane
    if tm >= M:
        tm = M
    else:
        tm = min(max(_LANE, (tm // _LANE) * _LANE), M)
    if min_steps > 1 and M > _LANE:
        per_step = (M + min_steps - 1) // min_steps
        cap = max(_LANE, ((per_step + _LANE - 1) // _LANE) * _LANE)
        tm = min(tm, cap)
    return tm


def _cost(flops, bytes_accessed):
    return pl.CostEstimate(flops=int(flops), transcendentals=0,
                           bytes_accessed=int(bytes_accessed))


# ----------------------------------------------------------------------------
# pallas_call builders.
# ----------------------------------------------------------------------------
def _nconv_shared_folded(x_fold, at, *, min_steps=2):
    """out = at @ x_fold.   x_fold: (V, K) with batch/channel/time folded into
    the lane dim; at: (Wout, V) fully resident.  1-D grid over lane tiles."""
    V, K = x_fold.shape
    Wout = at.shape[0]
    itemsize = jnp.dtype(x_fold.dtype).itemsize
    budget, limit = _vmem_limits()
    tk = _choose_tile(K, V, Wout, itemsize, a_per_batch=False,
                      min_steps=min_steps, budget=budget)
    grid = (pl.cdiv(K, tk),)

    return pl.pallas_call(
        _nconv_kernel,
        out_shape=jax.ShapeDtypeStruct((Wout, K), x_fold.dtype),
        grid_spec=pltpu.PrefetchScalarGridSpec(
            num_scalar_prefetch=0,
            grid=grid,
            in_specs=[
                pl.BlockSpec((Wout, V), lambda m: (0, 0)),   # resident A^T
                pl.BlockSpec((V, tk), lambda m: (0, m)),
            ],
            out_specs=pl.BlockSpec((Wout, tk), lambda m: (0, m)),
        ),
        compiler_params=pltpu.CompilerParams(
            dimension_semantics=("parallel",),
            vmem_limit_bytes=int(limit)),
        cost_estimate=_cost(2 * Wout * V * K,
                            itemsize * (V * K + Wout * K + Wout * V)),
    )(at, x_fold)


def _nconv_batched(x_vm, at):
    """out[n] = at[(n)] @ x_vm[n].  x_vm: (N, V, M); at: (Wout,V) or (N,Wout,V)."""
    N, V, M = x_vm.shape
    per_batch = at.ndim == 3
    Wout = at.shape[-2]
    itemsize = jnp.dtype(x_vm.dtype).itemsize
    budget, limit = _vmem_limits()
    # Guarantee >=2 total grid steps when the batch alone can't (v7x: 2 TCs).
    min_m_steps = 1 if N >= 2 else 2
    tm = _choose_tile(M, V, Wout, itemsize, a_per_batch=per_batch,
                      min_steps=min_m_steps, budget=budget)
    grid = (N, pl.cdiv(M, tm))

    if per_batch:
        at_spec = pl.BlockSpec((None, Wout, V), lambda n, m: (n, 0, 0))
    else:
        at_spec = pl.BlockSpec((Wout, V), lambda n, m: (0, 0))   # resident

    return pl.pallas_call(
        _nconv_kernel,
        out_shape=jax.ShapeDtypeStruct((N, Wout, M), x_vm.dtype),
        grid_spec=pltpu.PrefetchScalarGridSpec(
            num_scalar_prefetch=0,
            grid=grid,
            in_specs=[
                at_spec,
                pl.BlockSpec((None, V, tm), lambda n, m: (n, 0, m)),
            ],
            out_specs=pl.BlockSpec((None, Wout, tm), lambda n, m: (n, 0, m)),
        ),
        compiler_params=pltpu.CompilerParams(
            dimension_semantics=("parallel", "parallel"),
            vmem_limit_bytes=int(limit)),
        cost_estimate=_cost(
            2 * N * Wout * V * M,
            itemsize * (N * V * M + N * Wout * M
                        + (N if per_batch else 1) * Wout * V)),
    )(at, x_vm)


# ----------------------------------------------------------------------------
# Layout helpers + public forward functions.
# ----------------------------------------------------------------------------
def to_kernel_layout(x):
    """(N, C, V, L) -> ((N, V, C*L), (C, L)).  One-time HBM relayout; reuse the
    result across repeated nconv hops (mixprop) so the transpose is paid once."""
    N, C, V, L = x.shape
    return jnp.transpose(x, (0, 2, 1, 3)).reshape(N, V, C * L), (C, L)


def from_kernel_layout(y_vm, cl):
    """(N, Wout, C*L) -> (N, C, Wout, L)."""
    C, L = cl
    N, Wout, _ = y_vm.shape
    return jnp.transpose(y_vm.reshape(N, Wout, C, L), (0, 2, 1, 3))


def _effective_at(A, meta_att, dtype):
    """Returns the mixing matrix with rows indexing OUTPUT nodes (i.e. A^T for
    the einsum('ncvl,vw->ncwl') convention of the given module).  meta_att is
    folded algebraically:  meta @ (x A) == x (A @ meta^T), i.e. one matmul."""
    if A.ndim == 2:
        at = A.T                                   # (W, V), shared across batch
    else:
        at = jnp.transpose(A, (0, 2, 1))           # (N, W, V)
    if meta_att is not None:
        if at.ndim == 2:
            at = jnp.einsum('biw,wv->biv', meta_att, at)   # (N, I, V)
        else:
            at = jnp.einsum('biw,bwv->biv', meta_att, at)  # (N, I, V)
    return at.astype(dtype)


def nconv_forward_vm(x_vm, A, meta_att=None):
    """nconv on activations kept in kernel layout: (N, V, M) -> (N, Wout, M).
    Zero wrapper-side HBM transposes; chain this for repeated hops."""
    at = _effective_at(A, meta_att, x_vm.dtype)
    return _nconv_batched(x_vm, at)


def nconv_forward(x, A, meta_att=None, compute_dtype=None):
    """Drop-in nconv.forward.  x (N,C,V,L), A (V,W)|(N,V,W), meta (N,I,W)
    -> (N, C, Wout, L).

    The layout conversions here are one-time; for chained hops convert once
    with to_kernel_layout() and use nconv_forward_vm() instead."""
    N, C, V, L = x.shape
    if compute_dtype is not None:
        # bf16 I/O halves HBM traffic of this mem-bound kernel (f32 accumulate).
        x = x.astype(compute_dtype)
    at = _effective_at(A, meta_att, x.dtype)

    if at.ndim == 2:
        # Shared adjacency: fold batch into the lane dim -> one 2-D matmul with
        # A resident and fat (>=512-lane at real scale) steps.
        x_fold = jnp.transpose(x, (2, 0, 1, 3)).reshape(V, N * C * L)
        out = _nconv_shared_folded(x_fold, at)                  # (Wout, N*C*L)
        Wout = out.shape[0]
        return jnp.transpose(out.reshape(Wout, N, C, L), (1, 2, 0, 3))
    else:
        x_vm, cl = to_kernel_layout(x)                          # (N, V, C*L)
        return from_kernel_layout(_nconv_batched(x_vm, at), cl)


# ----------------------------------------------------------------------------
# Pure-JAX reference (mirrors the PyTorch module).
# ----------------------------------------------------------------------------
def _reference(x, A, meta_att=None):
    if A.ndim == 2:
        out = jnp.einsum('ncvl,vw->ncwl', x, A)
    else:
        out = jnp.einsum('ncvl,nvw->ncwl', x, A)
    if meta_att is not None:
        out = jnp.einsum('bin,bcnk->bcik', meta_att, out)
    return out


if __name__ == "__main__":
    key = jax.random.PRNGKey(0)
    k1, k2, k3, k4 = jax.random.split(key, 4)

    N, C, V, W, L = 2, 4, 16, 16, 8
    I = 16  # meta-attention output node dim

    x = jax.random.normal(k1, (N, C, V, L), dtype=jnp.float32)
    A2 = jax.random.normal(k2, (V, W), dtype=jnp.float32)        # shared adjacency
    A3 = jax.random.normal(k3, (N, V, W), dtype=jnp.float32)     # per-batch adjacency
    meta = jax.random.normal(k4, (N, I, W), dtype=jnp.float32)   # meta attention

    # 1) Shared-A path (batch folded into lanes, A resident).
    out2 = jax.block_until_ready(nconv_forward(x, A2))
    ref2 = _reference(x, A2)
    assert out2.shape == ref2.shape
    assert jnp.allclose(out2, ref2, atol=1e-4, rtol=1e-4)

    # 2) Per-batch adjacency path.
    out3 = jax.block_until_ready(nconv_forward(x, A3))
    ref3 = _reference(x, A3)
    assert jnp.allclose(out3, ref3, atol=1e-4, rtol=1e-4)

    # 3) Fused meta_att path (single pallas_call, no HBM intermediate).
    outm = jax.block_until_ready(nconv_forward(x, A3, meta_att=meta))
    refm = _reference(x, A3, meta_att=meta)
    assert jnp.allclose(outm, refm, atol=1e-3, rtol=1e-3)

    # 4) Persistent kernel-layout chaining (mixprop-style hops): the (C,V)
    #    relayout is paid once, not per hop (feedback item 1, option (a)).
    x_vm, cl = to_kernel_layout(x)
    h_vm = nconv_forward_vm(x_vm, A2)
    h_vm = nconv_forward_vm(h_vm, A2)
    hops = jax.block_until_ready(from_kernel_layout(h_vm, cl))
    ref_hops = _reference(_reference(x, A2), A2)
    assert jnp.allclose(hops, ref_hops, atol=1e-3, rtol=1e-3)

    # 5) Optional bf16 compute (halves HBM traffic; looser tolerance).
    outb = jax.block_until_ready(nconv_forward(x, A2, compute_dtype=jnp.bfloat16))
    assert jnp.allclose(outb.astype(jnp.float32), ref2, atol=0.25, rtol=0.05)

    print("KERNEL_OK")
</pallas_src>

<mosaic_0001>
module attributes {stable_mosaic.version = 11 : i64} {
  func.func @_nconv_kernel(%arg0: i32, %arg1: memref<16x16xf32, #tpu.memory_space<vmem>>, %arg2: memref<16x64xf32, #tpu.memory_space<vmem>>, %arg3: memref<16x64xf32, #tpu.memory_space<vmem>>) attributes {dimension_semantics = [#tpu.dimension_semantics<parallel>], iteration_bounds = array<i64: 1>, scalar_prefetch = 0 : i64, scratch_operands = 0 : i64, tpu.core_type = #tpu.core_type<tc>, window_params = [{pipeline_mode = #tpu.pipeline_mode<synchronous>, transform_indices = @transform_0, window_bounds = array<i64: 16, 16>}, {transform_indices = @transform_1, window_bounds = array<i64: 16, 64>}, {transform_indices = @transform_2, window_bounds = array<i64: 16, 64>}]} {
    %c0 = arith.constant 0 : index
    %c0_0 = arith.constant 0 : index
    %0 = vector.load %arg1[%c0, %c0_0] : memref<16x16xf32, #tpu.memory_space<vmem>>, vector<16x16xf32>
    %c0_1 = arith.constant 0 : index
    %c0_2 = arith.constant 0 : index
    %1 = vector.load %arg2[%c0_1, %c0_2] : memref<16x64xf32, #tpu.memory_space<vmem>>, vector<16x64xf32>
    %cst = arith.constant dense<0.000000e+00> : vector<16x64xf32>
    %2 = tpu.matmul %0, %1, %cst {dimension_numbers = #tpu.dot_dimension_numbers<[1], [0], [0], [1], [0, 0, 1, 1], [], []>} : vector<16x16xf32>, vector<16x64xf32>, vector<16x64xf32> -> vector<16x64xf32>
    %c0_3 = arith.constant 0 : index
    %c0_4 = arith.constant 0 : index
    %3 = vector.load %arg3[%c0_3, %c0_4] : memref<16x64xf32, #tpu.memory_space<vmem>>, vector<16x64xf32>
    tpu.vector_store %arg3[%c0_3, %c0_4], %2 {strides = array<i32>} : memref<16x64xf32, #tpu.memory_space<vmem>>, vector<16x64xf32>,
    return
  }
  func.func @transform_0(%arg0: i32) -> (i32, i32) {
    %c0_i32 = arith.constant 0 : i32
    %c0_i32_0 = arith.constant 0 : i32
    %c0_i32_1 = arith.constant 0 : i32
    return %c0_i32, %c0_i32_0 : i32, i32
  }
  func.func @transform_1(%arg0: i32) -> (i32, i32) {
    %c0_i32 = arith.constant 0 : i32
    %c0_i32_0 = arith.constant 0 : i32
    return %c0_i32, %arg0 : i32, i32
  }
  func.func @transform_2(%arg0: i32) -> (i32, i32) {
    %c0_i32 = arith.constant 0 : i32
    %c0_i32_0 = arith.constant 0 : i32
    return %c0_i32, %arg0 : i32, i32
  }
}

</mosaic_0001>

<bundles_post_ra>
// kernel: tpu_custom_call.1
= control target key start
LH: loop header
LB: loop body
LE: loop exit
PB: predicated region body
PF: predicated region fallthrough
CT: control target
= control target key end

     0   :  { %7 = vsyncpa [#allocation3], 0  ;;  %s269_s0 = inlined_call_operand.hbm [shape: f32[16,16], index: 0, kind: input, shape index: {}]   ;;  %s270_s1 = inlined_call_operand.hbm [shape: f32[16,64], index: 1, kind: input, shape index: {}]   ;;  %s271_s2 = inlined_call_operand.hbm [shape: f32[16,64], index: 2, kind: output, shape index: {}]  }
   0x1   :  { %8 = vsyncpa [#allocation6], 0 }
   0x2   :  { %9 = vsyncpa [#allocation4], 0  ;;  %s231_s9 = smov [#allocation2]  }
   0x3   :  { %s15_s10 = sshll.u32 %s231_s9, 4  ;;  %s16_s10 = int_to_ptr.vmem [resolvable:$true] %s15_s10 }
   0x4   :  { %s173_s11 = scalar_lea.vmem %s16_s10, 256  ;;  %p178_p1 = scmp.lt.s32.totalorder %s16_s10, %s16_s10 }
   0x5   :  { %p174_p0 = scmp.ne.s32.totalorder %s16_s10, %s173_s11  ;;  %p179_p2 = scmp.lt.s32.totalorder %s173_s11, %s173_s11 }
   0x7   :  { %p180_p3 = por %p179_p2, %p178_p1 }
   0x9   :  { %p181_p4 = pnand %p180_p3, %p174_p0 }
   0xb   :  { %184 = shalt.err (!%p181_p4)
}
   0xc   :  { %s232_s12 = smov 128   ;;  %s233_s13 = smov 8  }
   0xd   :  { %21 = dma.hbm_to_vmem [thread:$0]  %s269_s0, 256, %s16_s10, [#allocation3], %s232_s12, %s232_s12, %s233_s13  }
   0xe   :  { %s234_s16 = smov [#allocation5]  }
   0xf   :  { %s27_s17 = sshll.u32 %s234_s16, 4  ;;  %s28_s17 = int_to_ptr.vmem [resolvable:$true] %s27_s17 }
  0x10   :  { %s193_s18 = scalar_lea.vmem %s28_s17, 256  ;;  %p198_p6 = scmp.lt.s32.totalorder %s28_s17, %s28_s17 }
  0x11   :  { %p194_p5 = scmp.ne.s32.totalorder %s28_s17, %s193_s18  ;;  %p199_p7 = scmp.lt.s32.totalorder %s193_s18, %s193_s18 }
  0x13   :  { %p200_p8 = por %p199_p7, %p198_p6 }
  0x15   :  { %p201_p9 = pnand %p200_p8, %p194_p5 }
  0x17   :  { %204 = shalt.err (!%p201_p9)
}
  0x18   :  { %33 = dma.hbm_to_vmem [thread:$0]  %s270_s1, 256, %s28_s17, [#allocation6], %s232_s12, %s232_s12, %s233_s13  }
  0x19   :  { %225 = dma.done.wait [#allocation3], 256  }
  0x1a   :  { %226 = vsyncadd [#allocation3], 4294967040 }
  0x1b   :  { %227 = dma.done.wait [#allocation6], 256  }
  0x1c   :  { %228 = vsyncadd [#allocation6], 4294967040  ;;  %vm44_vm0 = vcmask 130048   ;;  %v43_v0 = vld [vmem:[#allocation5 + $0x8] sm:$0xff]  ;;  %v42_v1 = vld [vmem:[#allocation5] sm:$0xff]  ;;  %vm126_vm1 = vcmask 523264  }
  0x1d   :  { %v40_v2 = vld [vmem:[#allocation2] sm:$0xff]  ;;  %153 = vmatprep.subr.mxu0 %v43_v0  ;;  %v41_v3 = vld [vmem:[#allocation2 + $0x8] sm:$0xff]  ;;  %s235_s0 = smov [#allocation7]  }
  0x1e   :  { %157 = vmatprep.mubr.msk.f32.mxu0 %vm44_vm0, %v40_v2  ;;  %154 = vmatpush3.msra.mxu0 %v43_v0  ;;  %s134_s21 = sshll.u32 %s235_s0, 4  ;;  %s135_s21 = int_to_ptr.vmem [resolvable:$true] %s134_s21 }
  0x1f   :  { %155 = vmatprep.subr.mxu0 %v42_v1  ;;  %s205_s1 = scalar_lea.vmem %s135_s21, 256  ;;  %p210_p11 = scmp.lt.s32.totalorder %s135_s21, %s135_s21 }
  0x20   :  { %156 = vmatpush3.msra.mxu0 %v42_v1  ;;  %p206_p10 = scmp.ne.s32.totalorder %s135_s21, %s205_s1  ;;  %p211_p12 = scmp.lt.s32.totalorder %s205_s1, %s205_s1 }
  0x21   :  { %158 = vmatmul.mubr.msk.f32.vlgmr.msra.gmra.mxu0 %vm44_vm0, %v41_v3 }
  0x22   :  { %p212_p13 = por %p211_p12, %p210_p11 }
  0x24   :  { %p213_p0 = pnand %p212_p13, %p206_p10 }
  0xe1   :  { %v159_v4 = vpop.f32.mrf.mxu0 }
  0xe2   :  { %128 = vst.msk [vmem:[#allocation7 + $0x8] sm:$0xff] %vm126_vm1, %v159_v4 }
  0xe3   :  { %v117_v5 = vpop.f32.mrf.mxu0 }
  0xe4   :  { %127 = vst.msk [vmem:[#allocation7] sm:$0xff] %vm126_vm1, %v117_v5 }
  0xe5   :  { %216 = shalt.err (!%p213_p0)
}
  0xe6   :  { %140 = dma.vmem_to_hbm [thread:$0]  %s135_s21, 256, %s271_s2, [#allocation4], %s232_s12, %s232_s12, %s233_s13  }
  0xe7   :  { %229 = dma.done.wait [#allocation4], 256  }
  0xe8   :  { %230 = vsyncadd [#allocation4], 4294967040 }
  0xe9   :  { %144 = vsyncpa [#allocation3], 1 }
  0xea   :  { %145 = vsyncpa [#allocation6], 1 }
  0xeb   :  { %146 = vsyncpa [#allocation4], 1 }

</bundles_post_ra>
